<compile_context>
chip_gen: v6e
topology: v6e:2x2x1
jax: 0.10.0
libtpu: 0.0.40
codegen_flags: <defaults>
</compile_context>

<pallas_src>
import functools

import jax
import jax.numpy as jnp
from jax.experimental import pallas as pl
from jax.experimental.pallas import tpu as pltpu

LANE = 128  # TPU lane width; all feature dims are padded to this.


def _round_up(n, m):
    return (n + m - 1) // m * m


def _pad2(a, rows, cols):
    r, c = a.shape
    return jnp.pad(a, ((0, rows - r), (0, cols - c)))


# --------------------------------------------------------------------------
# Kernel: whole 4-layer MLP fused; all matmuls on the MXU, activations on
# VPU/EUP, both outputs written as lane-dense 128-wide tiles.
# --------------------------------------------------------------------------
def _autoencoder_kernel(x_ref,
                        w1_ref, b1_ref,
                        w2_ref, b2_ref,
                        w3_ref, b3_ref,
                        w4_ref, b4_ref,
                        enc_ref, dec_ref):
    x = x_ref[...]

    # ----- encoder -----
    h1 = jnp.dot(x, w1_ref[...], preferred_element_type=jnp.float32) + b1_ref[...]
    h1 = jnp.maximum(h1, 0.0)                                    # ReLU

    enc = jnp.dot(h1, w2_ref[...], preferred_element_type=jnp.float32) + b2_ref[...]
    enc = jnp.maximum(enc, 0.0)                                  # ReLU
    enc_ref[...] = enc.astype(enc_ref.dtype)                     # unmasked 128-lane store

    # ----- decoder -----
    h3 = jnp.dot(enc, w3_ref[...], preferred_element_type=jnp.float32) + b3_ref[...]
    h3 = jnp.maximum(h3, 0.0)                                    # ReLU

    logits = jnp.dot(h3, w4_ref[...], preferred_element_type=jnp.float32) + b4_ref[...]
    dec_ref[...] = jax.nn.sigmoid(logits).astype(dec_ref.dtype)  # EUP exp, robust sigmoid


# --------------------------------------------------------------------------
# Host-side, one-time parameter padding to 128-lane aligned layouts.
# Zero padding keeps the math identical through every ReLU layer.
# --------------------------------------------------------------------------
def pad_params(p):
    return dict(
        w1=_pad2(p["w1"], LANE, LANE), b1=_pad2(p["b1"], 1, LANE),
        w2=_pad2(p["w2"], LANE, LANE), b2=_pad2(p["b2"], 1, LANE),
        w3=_pad2(p["w3"], LANE, LANE), b3=_pad2(p["b3"], 1, LANE),
        w4=_pad2(p["w4"], LANE, LANE), b4=_pad2(p["b4"], 1, LANE),
    )


@functools.partial(jax.jit, static_argnums=(2, 3))
def autoencoder_forward(x, padded_params, latent_dim, in_dim):
    """x: (B, 88) f32. padded_params: output of pad_params().
    Returns (encoded (B, latent_dim), decoded (B, in_dim))."""
    B = x.shape[0]
    # 256-row tiles fill the v6e/v7x 256-wide MXU; clamp to the (8-aligned)
    # padded batch so tiny batches don't waste compute.
    TB = min(256, _round_up(B, 8))
    Bp = _round_up(B, TB)
    grid = (Bp // TB,)

    xp = jnp.pad(x.astype(jnp.float32),
                 ((0, Bp - B), (0, LANE - x.shape[1])))

    # Streaming (batch-blocked) tiles vs VMEM-resident weights/biases.
    row_spec = pl.BlockSpec((TB, LANE), lambda i: (i, 0))
    w_spec = pl.BlockSpec((LANE, LANE), lambda i: (0, 0))
    b_spec = pl.BlockSpec((1, LANE), lambda i: (0, 0))

    p = padded_params
    args = (xp,
            p["w1"], p["b1"], p["w2"], p["b2"],
            p["w3"], p["b3"], p["w4"], p["b4"])

    cost = pl.CostEstimate(
        flops=2 * Bp * LANE * LANE * 4,          # 4 (Bp,128)x(128,128) matmuls
        transcendentals=Bp * LANE,               # sigmoid exp
        bytes_accessed=4 * (3 * Bp * LANE + 4 * LANE * LANE + 4 * LANE),
    )

    enc_p, dec_p = pl.pallas_call(
        _autoencoder_kernel,
        out_shape=(jax.ShapeDtypeStruct((Bp, LANE), jnp.float32),
                   jax.ShapeDtypeStruct((Bp, LANE), jnp.float32)),
        grid=grid,
        in_specs=[row_spec,
                  w_spec, b_spec, w_spec, b_spec,
                  w_spec, b_spec, w_spec, b_spec],
        out_specs=(row_spec, row_spec),
        compiler_params=pltpu.CompilerParams(
            dimension_semantics=("parallel",)),   # shard batch across v7x's 2 TCs
        cost_estimate=cost,
    )(*args)

    # Padded lanes carry zeros (enc) / sigmoid(0)=0.5 (dec); slice them off.
    return enc_p[:B, :latent_dim], dec_p[:B, :in_dim]


# --------------------------------------------------------------------------
# Deterministic synthetic init (PyTorch-like uniform fan-in scaling) and a
# pure-JAX reference matching the PyTorch forward semantics.
# --------------------------------------------------------------------------
def init_params(key, mid_layer, latent_dim, in_dim=88):
    ks = jax.random.split(key, 8)

    def lin(kw, kb, fan_in, fan_out):
        bound = 1.0 / jnp.sqrt(fan_in)
        w = jax.random.uniform(kw, (fan_in, fan_out), jnp.float32, -bound, bound)
        b = jax.random.uniform(kb, (1, fan_out), jnp.float32, -bound, bound)
        return w, b

    w1, b1 = lin(ks[0], ks[1], in_dim, mid_layer)
    w2, b2 = lin(ks[2], ks[3], mid_layer, latent_dim)
    w3, b3 = lin(ks[4], ks[5], latent_dim, mid_layer)
    w4, b4 = lin(ks[6], ks[7], mid_layer, in_dim)
    return dict(w1=w1, b1=b1, w2=w2, b2=b2, w3=w3, b3=b3, w4=w4, b4=b4)


def reference_forward(x, p):
    h1 = jnp.maximum(x @ p["w1"] + p["b1"], 0.0)
    enc = jnp.maximum(h1 @ p["w2"] + p["b2"], 0.0)
    h3 = jnp.maximum(enc @ p["w3"] + p["b3"], 0.0)
    dec = jax.nn.sigmoid(h3 @ p["w4"] + p["b4"])
    return enc, dec


if __name__ == "__main__":
    key = jax.random.PRNGKey(0)
    k_x, k_p = jax.random.split(key)

    batch = 8
    in_dim = 88          # fixed by the module (nn.Linear(88, mid_layer))
    mid_layer = 32
    latent_dim = 16

    x = jax.random.normal(k_x, (batch, in_dim), dtype=jnp.float32)
    params = init_params(k_p, mid_layer, latent_dim, in_dim)
    padded = pad_params(params)   # one-time, host-side lane padding

    enc, dec = autoencoder_forward(x, padded, latent_dim, in_dim)
    enc, dec = jax.block_until_ready((enc, dec))

    enc_ref, dec_ref = reference_forward(x, params)
    assert enc.shape == (batch, latent_dim) and dec.shape == (batch, in_dim)
    assert jnp.allclose(enc, enc_ref, atol=1e-5, rtol=1e-5)
    assert jnp.allclose(dec, dec_ref, atol=1e-5, rtol=1e-5)

    print("KERNEL_OK")
</pallas_src>

<mosaic_0001>
module attributes {stable_mosaic.version = 11 : i64} {
  func.func @_autoencoder_kernel(%arg0: i32, %arg1: memref<8x128xf32, #tpu.memory_space<vmem>>, %arg2: memref<128x128xf32, #tpu.memory_space<vmem>>, %arg3: memref<1x128xf32, #tpu.memory_space<vmem>>, %arg4: memref<128x128xf32, #tpu.memory_space<vmem>>, %arg5: memref<1x128xf32, #tpu.memory_space<vmem>>, %arg6: memref<128x128xf32, #tpu.memory_space<vmem>>, %arg7: memref<1x128xf32, #tpu.memory_space<vmem>>, %arg8: memref<128x128xf32, #tpu.memory_space<vmem>>, %arg9: memref<1x128xf32, #tpu.memory_space<vmem>>, %arg10: memref<8x128xf32, #tpu.memory_space<vmem>>, %arg11: memref<8x128xf32, #tpu.memory_space<vmem>>) attributes {dimension_semantics = [#tpu.dimension_semantics<parallel>], iteration_bounds = array<i64: 1>, scalar_prefetch = 0 : i64, scratch_operands = 0 : i64, tpu.core_type = #tpu.core_type<tc>, window_params = [{transform_indices = @transform_0, window_bounds = array<i64: 8, 128>}, {pipeline_mode = #tpu.pipeline_mode<synchronous>, transform_indices = @transform_1, window_bounds = array<i64: 128, 128>}, {pipeline_mode = #tpu.pipeline_mode<synchronous>, transform_indices = @transform_2, window_bounds = array<i64: 1, 128>}, {pipeline_mode = #tpu.pipeline_mode<synchronous>, transform_indices = @transform_3, window_bounds = array<i64: 128, 128>}, {pipeline_mode = #tpu.pipeline_mode<synchronous>, transform_indices = @transform_4, window_bounds = array<i64: 1, 128>}, {pipeline_mode = #tpu.pipeline_mode<synchronous>, transform_indices = @transform_5, window_bounds = array<i64: 128, 128>}, {pipeline_mode = #tpu.pipeline_mode<synchronous>, transform_indices = @transform_6, window_bounds = array<i64: 1, 128>}, {pipeline_mode = #tpu.pipeline_mode<synchronous>, transform_indices = @transform_7, window_bounds = array<i64: 128, 128>}, {pipeline_mode = #tpu.pipeline_mode<synchronous>, transform_indices = @transform_8, window_bounds = array<i64: 1, 128>}, {transform_indices = @transform_9, window_bounds = array<i64: 8, 128>}, {transform_indices = @transform_10, window_bounds = array<i64: 8, 128>}]} {
    %c0 = arith.constant 0 : index
    %c0_0 = arith.constant 0 : index
    %0 = vector.load %arg1[%c0, %c0_0] : memref<8x128xf32, #tpu.memory_space<vmem>>, vector<8x128xf32>
    %c0_1 = arith.constant 0 : index
    %c0_2 = arith.constant 0 : index
    %1 = vector.load %arg2[%c0_1, %c0_2] : memref<128x128xf32, #tpu.memory_space<vmem>>, vector<128x128xf32>
    %cst = arith.constant dense<0.000000e+00> : vector<8x128xf32>
    %2 = tpu.matmul %0, %1, %cst {dimension_numbers = #tpu.dot_dimension_numbers<[1], [0], [0], [1], [0, 0, 1, 1], [], []>} : vector<8x128xf32>, vector<128x128xf32>, vector<8x128xf32> -> vector<8x128xf32>
    %c0_3 = arith.constant 0 : index
    %c0_4 = arith.constant 0 : index
    %3 = vector.load %arg3[%c0_3, %c0_4] : memref<1x128xf32, #tpu.memory_space<vmem>>, vector<1x128xf32>
    %4 = vector.broadcast %3 : vector<1x128xf32> to vector<8x128xf32>
    %5 = arith.addf %2, %4 : vector<8x128xf32>
    %cst_5 = arith.constant 0.000000e+00 : f32
    %6 = vector.broadcast %cst_5 : f32 to vector<8x128xf32>
    %7 = arith.maximumf %5, %6 : vector<8x128xf32>
    %c0_6 = arith.constant 0 : index
    %c0_7 = arith.constant 0 : index
    %8 = vector.load %arg4[%c0_6, %c0_7] : memref<128x128xf32, #tpu.memory_space<vmem>>, vector<128x128xf32>
    %cst_8 = arith.constant dense<0.000000e+00> : vector<8x128xf32>
    %9 = tpu.matmul %7, %8, %cst_8 {dimension_numbers = #tpu.dot_dimension_numbers<[1], [0], [0], [1], [0, 0, 1, 1], [], []>} : vector<8x128xf32>, vector<128x128xf32>, vector<8x128xf32> -> vector<8x128xf32>
    %c0_9 = arith.constant 0 : index
    %c0_10 = arith.constant 0 : index
    %10 = vector.load %arg5[%c0_9, %c0_10] : memref<1x128xf32, #tpu.memory_space<vmem>>, vector<1x128xf32>
    %11 = vector.broadcast %10 : vector<1x128xf32> to vector<8x128xf32>
    %12 = arith.addf %9, %11 : vector<8x128xf32>
    %cst_11 = arith.constant 0.000000e+00 : f32
    %13 = vector.broadcast %cst_11 : f32 to vector<8x128xf32>
    %14 = arith.maximumf %12, %13 : vector<8x128xf32>
    %c0_12 = arith.constant 0 : index
    %c0_13 = arith.constant 0 : index
    %15 = vector.load %arg10[%c0_12, %c0_13] : memref<8x128xf32, #tpu.memory_space<vmem>>, vector<8x128xf32>
    tpu.vector_store %arg10[%c0_12, %c0_13], %14 {strides = array<i32>} : memref<8x128xf32, #tpu.memory_space<vmem>>, vector<8x128xf32>,
    %c0_14 = arith.constant 0 : index
    %c0_15 = arith.constant 0 : index
    %16 = vector.load %arg6[%c0_14, %c0_15] : memref<128x128xf32, #tpu.memory_space<vmem>>, vector<128x128xf32>
    %cst_16 = arith.constant dense<0.000000e+00> : vector<8x128xf32>
    %17 = tpu.matmul %14, %16, %cst_16 {dimension_numbers = #tpu.dot_dimension_numbers<[1], [0], [0], [1], [0, 0, 1, 1], [], []>} : vector<8x128xf32>, vector<128x128xf32>, vector<8x128xf32> -> vector<8x128xf32>
    %c0_17 = arith.constant 0 : index
    %c0_18 = arith.constant 0 : index
    %18 = vector.load %arg7[%c0_17, %c0_18] : memref<1x128xf32, #tpu.memory_space<vmem>>, vector<1x128xf32>
    %19 = vector.broadcast %18 : vector<1x128xf32> to vector<8x128xf32>
    %20 = arith.addf %17, %19 : vector<8x128xf32>
    %cst_19 = arith.constant 0.000000e+00 : f32
    %21 = vector.broadcast %cst_19 : f32 to vector<8x128xf32>
    %22 = arith.maximumf %20, %21 : vector<8x128xf32>
    %c0_20 = arith.constant 0 : index
    %c0_21 = arith.constant 0 : index
    %23 = vector.load %arg8[%c0_20, %c0_21] : memref<128x128xf32, #tpu.memory_space<vmem>>, vector<128x128xf32>
    %cst_22 = arith.constant dense<0.000000e+00> : vector<8x128xf32>
    %24 = tpu.matmul %22, %23, %cst_22 {dimension_numbers = #tpu.dot_dimension_numbers<[1], [0], [0], [1], [0, 0, 1, 1], [], []>} : vector<8x128xf32>, vector<128x128xf32>, vector<8x128xf32> -> vector<8x128xf32>
    %c0_23 = arith.constant 0 : index
    %c0_24 = arith.constant 0 : index
    %25 = vector.load %arg9[%c0_23, %c0_24] : memref<1x128xf32, #tpu.memory_space<vmem>>, vector<1x128xf32>
    %26 = vector.broadcast %25 : vector<1x128xf32> to vector<8x128xf32>
    %27 = arith.addf %24, %26 : vector<8x128xf32>
    %28 = arith.negf %27 : vector<8x128xf32>
    %29 = math.exp %28 : vector<8x128xf32>
    %cst_25 = arith.constant 1.000000e+00 : f32
    %30 = vector.broadcast %cst_25 : f32 to vector<8x128xf32>
    %31 = arith.addf %30, %29 : vector<8x128xf32>
    %32 = arith.divf %30, %31 : vector<8x128xf32>
    %c0_26 = arith.constant 0 : index
    %c0_27 = arith.constant 0 : index
    %33 = vector.load %arg11[%c0_26, %c0_27] : memref<8x128xf32, #tpu.memory_space<vmem>>, vector<8x128xf32>
    tpu.vector_store %arg11[%c0_26, %c0_27], %32 {strides = array<i32>} : memref<8x128xf32, #tpu.memory_space<vmem>>, vector<8x128xf32>,
    return
  }
  func.func @transform_0(%arg0: i32) -> (i32, i32) {
    %c0_i32 = arith.constant 0 : i32
    %c0_i32_0 = arith.constant 0 : i32
    return %arg0, %c0_i32 : i32, i32
  }
  func.func @transform_1(%arg0: i32) -> (i32, i32) {
    %c0_i32 = arith.constant 0 : i32
    %c0_i32_0 = arith.constant 0 : i32
    %c0_i32_1 = arith.constant 0 : i32
    return %c0_i32, %c0_i32_0 : i32, i32
  }
  func.func @transform_2(%arg0: i32) -> (i32, i32) {
    %c0_i32 = arith.constant 0 : i32
    %c0_i32_0 = arith.constant 0 : i32
    %c0_i32_1 = arith.constant 0 : i32
    return %c0_i32, %c0_i32_0 : i32, i32
  }
  func.func @transform_3(%arg0: i32) -> (i32, i32) {
    %c0_i32 = arith.constant 0 : i32
    %c0_i32_0 = arith.constant 0 : i32
    %c0_i32_1 = arith.constant 0 : i32
    return %c0_i32, %c0_i32_0 : i32, i32
  }
  func.func @transform_4(%arg0: i32) -> (i32, i32) {
    %c0_i32 = arith.constant 0 : i32
    %c0_i32_0 = arith.constant 0 : i32
    %c0_i32_1 = arith.constant 0 : i32
    return %c0_i32, %c0_i32_0 : i32, i32
  }
  func.func @transform_5(%arg0: i32) -> (i32, i32) {
    %c0_i32 = arith.constant 0 : i32
    %c0_i32_0 = arith.constant 0 : i32
    %c0_i32_1 = arith.constant 0 : i32
    return %c0_i32, %c0_i32_0 : i32, i32
  }
  func.func @transform_6(%arg0: i32) -> (i32, i32) {
    %c0_i32 = arith.constant 0 : i32
    %c0_i32_0 = arith.constant 0 : i32
    %c0_i32_1 = arith.constant 0 : i32
    return %c0_i32, %c0_i32_0 : i32, i32
  }
  func.func @transform_7(%arg0: i32) -> (i32, i32) {
    %c0_i32 = arith.constant 0 : i32
    %c0_i32_0 = arith.constant 0 : i32
    %c0_i32_1 = arith.constant 0 : i32
    return %c0_i32, %c0_i32_0 : i32, i32
  }
  func.func @transform_8(%arg0: i32) -> (i32, i32) {
    %c0_i32 = arith.constant 0 : i32
    %c0_i32_0 = arith.constant 0 : i32
    %c0_i32_1 = arith.constant 0 : i32
    return %c0_i32, %c0_i32_0 : i32, i32
  }
  func.func @transform_9(%arg0: i32) -> (i32, i32) {
    %c0_i32 = arith.constant 0 : i32
    %c0_i32_0 = arith.constant 0 : i32
    return %arg0, %c0_i32 : i32, i32
  }
  func.func @transform_10(%arg0: i32) -> (i32, i32) {
    %c0_i32 = arith.constant 0 : i32
    %c0_i32_0 = arith.constant 0 : i32
    return %arg0, %c0_i32 : i32, i32
  }
}

</mosaic_0001>

<bundles_post_ra>
// kernel: autoencoder_forward.1
= control target key start
LH: loop header
LB: loop body
LE: loop exit
PB: predicated region body
PF: predicated region fallthrough
CT: control target
= control target key end

     0   :  { %16 = vsyncpa [#allocation3], 0  ;;  %s1045_s0 = inlined_call_operand.vmem [shape: f32[8,128], index: 0, kind: input, shape index: {}]   ;;  %s1046_s1 = inlined_call_operand.hbm [shape: f32[128,128], index: 1, kind: input, shape index: {}]   ;;  %s1047_s2 = inlined_call_operand.vmem [shape: f32[1,128], index: 2, kind: input, shape index: {}]   ;;  %s1048_s3 = inlined_call_operand.hbm [shape: f32[128,128], index: 3, kind: input, shape index: {}]   ;;  %s1049_s4 = inlined_call_operand.vmem [shape: f32[1,128], index: 4, kind: input, shape index: {}]   ;;  %s1050_s5 = inlined_call_operand.hbm [shape: f32[128,128], index: 5, kind: input, shape index: {}]   ;;  %s1051_s6 = inlined_call_operand.vmem [shape: f32[1,128], index: 6, kind: input, shape index: {}]   ;;  %s1052_s7 = inlined_call_operand.hbm [shape: f32[128,128], index: 7, kind: input, shape index: {}]   ;;  %s1053_s8 = inlined_call_operand.vmem [shape: f32[1,128], index: 8, kind: input, shape index: {}]   ;;  %s1054_s9 = inlined_call_operand.hbm [shape: f32[8,128], index: 9, kind: output, shape index: {0}]   ;;  %s1055_s10 = inlined_call_operand.hbm [shape: f32[8,128], index: 10, kind: output, shape index: {1}]  }
   0x1   :  { %17 = vsyncpa [#allocation6], 0 }
   0x2   :  { %18 = vsyncpa [#allocation9], 0 }
   0x3   :  { %19 = vsyncpa [#allocation4], 0 }
   0x4   :  { %20 = vsyncpa [#allocation12], 0  ;;  %s863_s13 = smov [#allocation5]   ;;  %s864_s15 = smov [#allocation2]  }
   0x5   :  { %s42_s14 = sshll.u32 %s863_s13, 4  ;;  %s28_s16 = sshll.u32 %s864_s15, 4  ;;  %s43_s14 = int_to_ptr.vmem [resolvable:$true] %s42_s14  ;;  %s29_s16 = int_to_ptr.vmem [resolvable:$true] %s28_s16 }
   0x6   :  { %s741_s17 = scalar_lea.vmem %s43_s14, 2048  ;;  %p746_p1 = scmp.lt.s32.totalorder %s43_s14, %s43_s14 }
   0x7   :  { %p742_p0 = scmp.ne.s32.totalorder %s43_s14, %s741_s17  ;;  %p747_p2 = scmp.lt.s32.totalorder %s741_s17, %s741_s17 }
   0x9   :  { %p748_p3 = por %p747_p2, %p746_p1 }
   0xb   :  { %p749_p4 = pnand %p748_p3, %p742_p0 }
   0xd   :  { %752 = shalt.err (!%p749_p4)
}
   0xe   :  { %s865_s18 = smov 128   ;;  %s866_s19 = smov 8  }
   0xf   :  { %48 = dma.hbm_to_vmem [thread:$0]  %s1048_s3, 2048, %s43_s14, [#allocation6], %s865_s18, %s865_s18, %s866_s19  }
  0x10   :  { %s761_s22 = scalar_lea.vmem %s29_s16, 2048  ;;  %p766_p6 = scmp.lt.s32.totalorder %s29_s16, %s29_s16 }
  0x11   :  { %p762_p5 = scmp.ne.s32.totalorder %s29_s16, %s761_s22  ;;  %p767_p7 = scmp.lt.s32.totalorder %s761_s22, %s761_s22 }
  0x13   :  { %p768_p8 = por %p767_p7, %p766_p6 }
  0x15   :  { %p769_p9 = pnand %p768_p8, %p762_p5 }
  0x17   :  { %772 = shalt.err (!%p769_p9)
}
  0x18   :  { %34 = dma.hbm_to_vmem [thread:$0]  %s1046_s1, 2048, %s29_s16, [#allocation3], %s865_s18, %s865_s18, %s866_s19  }
  0x19   :  { %s867_s25 = smov [#allocation7]   ;;  %s868_s27 = smov [#allocation8]  }
  0x1a   :  { %s56_s26 = sshll.u32 %s867_s25, 4  ;;  %s70_s28 = sshll.u32 %s868_s27, 4  ;;  %s57_s26 = int_to_ptr.vmem [resolvable:$true] %s56_s26  ;;  %s71_s28 = int_to_ptr.vmem [resolvable:$true] %s70_s28 }
  0x1b   :  { %s781_s3 = scalar_lea.vmem %s57_s26, 2048  ;;  %p786_p11 = scmp.lt.s32.totalorder %s57_s26, %s57_s26 }
  0x1c   :  { %p782_p10 = scmp.ne.s32.totalorder %s57_s26, %s781_s3  ;;  %p787_p12 = scmp.lt.s32.totalorder %s781_s3, %s781_s3 }
  0x1e   :  { %p788_p13 = por %p787_p12, %p786_p11 }
  0x20   :  { %p789_p0 = pnand %p788_p13, %p782_p10 }
  0x22   :  { %792 = shalt.err (!%p789_p0)
}
  0x23   :  { %62 = dma.hbm_to_vmem [thread:$0]  %s1050_s5, 2048, %s57_s26, [#allocation6], %s865_s18, %s865_s18, %s866_s19  }
  0x24   :  { %s801_s1 = scalar_lea.vmem %s71_s28, 2048  ;;  %p806_p2 = scmp.lt.s32.totalorder %s71_s28, %s71_s28 }
  0x25   :  { %p802_p1 = scmp.ne.s32.totalorder %s71_s28, %s801_s1  ;;  %p807_p3 = scmp.lt.s32.totalorder %s801_s1, %s801_s1 }
  0x27   :  { %p808_p4 = por %p807_p3, %p806_p2 }
  0x29   :  { %p809_p5 = pnand %p808_p4, %p802_p1 }
  0x2b   :  { %812 = shalt.err (!%p809_p5)
}
  0x2c   :  { %76 = dma.hbm_to_vmem [thread:$0]  %s1052_s7, 2048, %s71_s28, [#allocation9], %s865_s18, %s865_s18, %s866_s19  }
  0x2d   :  { %853 = dma.done.wait [#allocation3], 2048  }
  0x2e   :  { %854 = vsyncadd [#allocation3], 4294965248 }
  0x2f   :  { %855 = dma.done.wait [#allocation6], 4096  }
  0x30   :  { %856 = vsyncadd [#allocation6], 4294963200 }
  0x31   :  { %857 = dma.done.wait [#allocation9], 2048  }
  0x32   :  { %858 = vsyncadd [#allocation9], 4294965248  ;;  %v869_v0 = vmov 0.0   ;;  %vm870_vm0 = vmmov 0   ;;  %v107_v1 = vld [vmem:[#allocation2 + $0x78] sm:$0xff]  ;;  %v106_v2 = vld [vmem:[#allocation2 + $0x70] sm:$0xff] }
  0x33   :  { %579 = vmatprep.subr.mxu0 %v869_v0  ;;  %611 = vmatprep.mubr.msk.f32.mxu0 %vm870_vm0, %v869_v0  ;;  %v105_v3 = vld [vmem:[#allocation2 + $0x68] sm:$0xff]  ;;  %v104_v4 = vld [vmem:[#allocation2 + $0x60] sm:$0xff]  ;;  %v201_v5 = vld [vmem:[#allocation5 + $0x78] sm:$0xff] }
  0x34   :  { %614 = vmatprep.subr.mxu1 %v869_v0  ;;  %646 = vmatprep.mubr.msk.f32.mxu1 %vm870_vm0, %v869_v0  ;;  %v103_v6 = vld [vmem:[#allocation2 + $0x58] sm:$0xff]  ;;  %v200_v7 = vld [vmem:[#allocation5 + $0x70] sm:$0xff]  ;;  %v199_v8 = vld [vmem:[#allocation5 + $0x68] sm:$0xff] }
  0x35   :  { %580 = vmatpush3.msra.mxu0 %v107_v1  ;;  %615 = vmatpush3.msra.mxu1 %v201_v5  ;;  %v102_v9 = vld [vmem:[#allocation2 + $0x50] sm:$0xff]  ;;  %v198_v10 = vld [vmem:[#allocation5 + $0x60] sm:$0xff]  ;;  %v101_v11 = vld [vmem:[#allocation2 + $0x48] sm:$0xff] }
  0x36   :  { %581 = vmatprep.subr.mxu0 %v869_v0  ;;  %616 = vmatprep.subr.mxu1 %v869_v0  ;;  %v197_v12 = vld [vmem:[#allocation5 + $0x58] sm:$0xff]  ;;  %v100_v13 = vld [vmem:[#allocation2 + $0x40] sm:$0xff]  ;;  %v196_v14 = vld [vmem:[#allocation5 + $0x50] sm:$0xff] }
  0x37   :  { %582 = vmatpush3.msra.mxu0 %v106_v2  ;;  %617 = vmatpush3.msra.mxu1 %v200_v7  ;;  %v99_v15 = vld [vmem:[#allocation2 + $0x38] sm:$0xff]  ;;  %v195_v16 = vld [vmem:[#allocation5 + $0x48] sm:$0xff]  ;;  %v98_v17 = vld [vmem:[#allocation2 + $0x30] sm:$0xff] }
  0x38   :  { %583 = vmatprep.subr.mxu0 %v869_v0  ;;  %618 = vmatprep.subr.mxu1 %v869_v0  ;;  %v194_v18 = vld [vmem:[#allocation5 + $0x40] sm:$0xff]  ;;  %v97_v19 = vld [vmem:[#allocation2 + $0x28] sm:$0xff]  ;;  %v193_v20 = vld [vmem:[#allocation5 + $0x38] sm:$0xff] }
  0x39   :  { %584 = vmatpush3.msra.mxu0 %v105_v3  ;;  %619 = vmatpush3.msra.mxu1 %v199_v8  ;;  %v96_v21 = vld [vmem:[#allocation2 + $0x20] sm:$0xff]  ;;  %v192_v22 = vld [vmem:[#allocation5 + $0x30] sm:$0xff]  ;;  %v95_v23 = vld [vmem:[#allocation2 + $0x18] sm:$0xff] }
  0x3a   :  { %585 = vmatprep.subr.mxu0 %v869_v0  ;;  %620 = vmatprep.subr.mxu1 %v869_v0  ;;  %v191_v24 = vld [vmem:[#allocation5 + $0x28] sm:$0xff]  ;;  %v94_v25 = vld [vmem:[#allocation2 + $0x10] sm:$0xff]  ;;  %v190_v26 = vld [vmem:[#allocation5 + $0x20] sm:$0xff] }
  0x3b   :  { %586 = vmatpush3.msra.mxu0 %v104_v4  ;;  %621 = vmatpush3.msra.mxu1 %v198_v10  ;;  %v93_v27 = vld [vmem:[#allocation2 + $0x8] sm:$0xff]  ;;  %v189_v28 = vld [vmem:[#allocation5 + $0x18] sm:$0xff]  ;;  %v92_v29 = vld [vmem:[#allocation2] sm:$0xff] }
  0x3c   :  { %587 = vmatprep.subr.mxu0 %v869_v0  ;;  %622 = vmatprep.subr.mxu1 %v869_v0  ;;  %v91_v30 = vld [vmem:[%s1045_s0] sm:$0xff]  ;;  %v188_v31 = vld [vmem:[#allocation5 + $0x10] sm:$0xff]  ;;  %v187_v32 = vld [vmem:[#allocation5 + $0x8] sm:$0xff] }
  0x3d   :  { %588 = vmatpush3.msra.mxu0 %v103_v6  ;;  %623 = vmatpush3.msra.mxu1 %v197_v12  ;;  %v186_v33 = vld [vmem:[#allocation5] sm:$0xff]  ;;  %v296_v34 = vld [vmem:[#allocation7 + $0x78] sm:$0xff]  ;;  %v295_v35 = vld [vmem:[#allocation7 + $0x70] sm:$0xff] }
  0x3e   :  { %589 = vmatprep.subr.mxu0 %v869_v0  ;;  %624 = vmatprep.subr.mxu1 %v869_v0  ;;  %v294_v36 = vld [vmem:[#allocation7 + $0x68] sm:$0xff]  ;;  %v293_v37 = vld [vmem:[#allocation7 + $0x60] sm:$0xff]  ;;  %v292_v38 = vld [vmem:[#allocation7 + $0x58] sm:$0xff] }
  0x3f   :  { %590 = vmatpush3.msra.mxu0 %v102_v9  ;;  %625 = vmatpush3.msra.mxu1 %v196_v14  ;;  %v291_v39 = vld [vmem:[#allocation7 + $0x50] sm:$0xff]  ;;  %v290_v40 = vld [vmem:[#allocation7 + $0x48] sm:$0xff]  ;;  %v289_v41 = vld [vmem:[#allocation7 + $0x40] sm:$0xff] }
  0x40   :  { %591 = vmatprep.subr.mxu0 %v869_v0  ;;  %626 = vmatprep.subr.mxu1 %v869_v0  ;;  %v288_v42 = vld [vmem:[#allocation7 + $0x38] sm:$0xff]  ;;  %v287_v43 = vld [vmem:[#allocation7 + $0x30] sm:$0xff]  ;;  %v286_v44 = vld [vmem:[#allocation7 + $0x28] sm:$0xff] }
  0x41   :  { %592 = vmatpush3.msra.mxu0 %v101_v11  ;;  %627 = vmatpush3.msra.mxu1 %v195_v16  ;;  %v285_v45 = vld [vmem:[#allocation7 + $0x20] sm:$0xff]  ;;  %v284_v46 = vld [vmem:[#allocation7 + $0x18] sm:$0xff]  ;;  %v283_v52 = vld [vmem:[#allocation7 + $0x10] sm:$0xff] }
  0x42   :  { %593 = vmatprep.subr.mxu0 %v869_v0  ;;  %628 = vmatprep.subr.mxu1 %v869_v0  ;;  %v506_v47 = vld [vmem:[%s1047_s2] ss:$0 sm:$0xff]  ;;  %v282_v53 = vld [vmem:[#allocation7 + $0x8] sm:$0xff]  ;;  %v390_v55 = vld [vmem:[#allocation8 + $0x78] sm:$0xff] }
  0x43   :  { %594 = vmatpush3.msra.mxu0 %v100_v13  ;;  %629 = vmatpush3.msra.mxu1 %v194_v18  ;;  %v281_v54 = vld [vmem:[#allocation7] sm:$0xff]  ;;  %v389_v56 = vld [vmem:[#allocation8 + $0x70] sm:$0xff]  ;;  %v388_v57 = vld [vmem:[#allocation8 + $0x68] sm:$0xff] }
  0x44   :  { %595 = vmatprep.subr.mxu0 %v869_v0  ;;  %630 = vmatprep.subr.mxu1 %v869_v0  ;;  %v387_v58 = vld [vmem:[#allocation8 + $0x60] sm:$0xff]  ;;  %v386_v59 = vld [vmem:[#allocation8 + $0x58] sm:$0xff]  ;;  %v385_v60 = vld [vmem:[#allocation8 + $0x50] sm:$0xff] }
  0x45   :  { %596 = vmatpush3.msra.mxu0 %v99_v15  ;;  %631 = vmatpush3.msra.mxu1 %v193_v20  ;;  %v384_v61 = vld [vmem:[#allocation8 + $0x48] sm:$0xff]  ;;  %v383_v62 = vld [vmem:[#allocation8 + $0x40] sm:$0xff]  ;;  %v382_v63 = vld [vmem:[#allocation8 + $0x38] sm:$0xff] }
  0x46   :  { %597 = vmatprep.subr.mxu0 %v869_v0  ;;  %632 = vmatprep.subr.mxu1 %v869_v0  ;;  %v381_v1 = vld [vmem:[#allocation8 + $0x30] sm:$0xff]  ;;  %v380_v2 = vld [vmem:[#allocation8 + $0x28] sm:$0xff]  ;;  %v379_v3 = vld [vmem:[#allocation8 + $0x20] sm:$0xff] }
  0x47   :  { %598 = vmatpush3.msra.mxu0 %v98_v17  ;;  %633 = vmatpush3.msra.mxu1 %v192_v22  ;;  %v378_v4 = vld [vmem:[#allocation8 + $0x18] sm:$0xff]  ;;  %v507_v5 = vld [vmem:[%s1049_s4] ss:$0 sm:$0xff]  ;;  %v377_v10 = vld [vmem:[#allocation8 + $0x10] sm:$0xff]  ;;  %s871_s4 = smov [#allocation10]  }
  0x48   :  { %599 = vmatprep.subr.mxu0 %v869_v0  ;;  %634 = vmatprep.subr.mxu1 %v869_v0  ;;  %v376_v11 = vld [vmem:[#allocation8 + $0x8] sm:$0xff]  ;;  %v375_v12 = vld [vmem:[#allocation8] sm:$0xff]  ;;  %s481_s17 = sshll.u32 %s871_s4, 4  ;;  %s482_s17 = int_to_ptr.vmem [resolvable:$true] %s481_s17 }
  0x49   :  { %600 = vmatpush3.msra.mxu0 %v97_v19  ;;  %635 = vmatpush3.msra.mxu1 %v191_v24  ;;  %v508_v13 = vld [vmem:[%s1051_s6] ss:$0 sm:$0xff]  ;;  %s813_s18 = scalar_lea.vmem %s482_s17, 128  ;;  %p818_p7 = scmp.lt.s32.totalorder %s482_s17, %s482_s17 }
  0x4a   :  { %601 = vmatprep.subr.mxu0 %v869_v0  ;;  %636 = vmatprep.subr.mxu1 %v869_v0  ;;  %p814_p6 = scmp.ne.s32.totalorder %s482_s17, %s813_s18  ;;  %p819_p8 = scmp.lt.s32.totalorder %s813_s18, %s813_s18 }
  0x4b   :  { %602 = vmatpush3.msra.mxu0 %v96_v21  ;;  %637 = vmatpush3.msra.mxu1 %v190_v26 }
  0x4c   :  { %603 = vmatprep.subr.mxu0 %v869_v0  ;;  %638 = vmatprep.subr.mxu1 %v869_v0  ;;  %p820_p9 = por %p819_p8, %p818_p7 }
  0x4d   :  { %604 = vmatpush3.msra.mxu0 %v95_v23  ;;  %639 = vmatpush3.msra.mxu1 %v189_v28 }
  0x4e   :  { %605 = vmatprep.subr.mxu0 %v869_v0  ;;  %640 = vmatprep.subr.mxu1 %v869_v0  ;;  %p821_p10 = pnand %p820_p9, %p814_p6 }
  0x4f   :  { %606 = vmatpush3.msra.mxu0 %v94_v25  ;;  %641 = vmatpush3.msra.mxu1 %v188_v31 }
  0x50   :  { %607 = vmatprep.subr.mxu0 %v869_v0  ;;  %642 = vmatprep.subr.mxu1 %v869_v0 }
  0x51   :  { %608 = vmatpush3.msra.mxu0 %v93_v27  ;;  %643 = vmatpush3.msra.mxu1 %v187_v32 }
  0x52   :  { %609 = vmatprep.subr.mxu0 %v869_v0  ;;  %644 = vmatprep.subr.mxu1 %v869_v0 }
  0x53   :  { %610 = vmatpush3.msra.mxu0 %v92_v29  ;;  %645 = vmatpush3.msra.mxu1 %v186_v33 }
  0x54   :  { %612 = vmatmul.mubr.f32.vlgmr.msra.gmra.mxu0 %v91_v30  ;;  %649 = vmatprep.subr.mxu0 %v869_v0 }
  0x55   :  { %681 = vmatprep.mubr.msk.f32.mxu0 %vm870_vm0, %v869_v0  ;;  %684 = vmatprep.subr.mxu1 %v869_v0 }
  0x56   :  { %650 = vmatpush3.msra.mxu0 %v296_v34 }
  0x57   :  { %651 = vmatprep.subr.mxu0 %v869_v0 }
  0x58   :  { %652 = vmatpush3.msra.mxu0 %v295_v35 }
  0x59   :  { %653 = vmatprep.subr.mxu0 %v869_v0 }
  0x5a   :  { %654 = vmatpush3.msra.mxu0 %v294_v36 }
  0x5b   :  { %655 = vmatprep.subr.mxu0 %v869_v0 }
  0x5c   :  { %656 = vmatpush3.msra.mxu0 %v293_v37 }
  0x5d   :  { %657 = vmatprep.subr.mxu0 %v869_v0 }
  0x5e   :  { %658 = vmatpush3.msra.mxu0 %v292_v38 }
  0x5f   :  { %659 = vmatprep.subr.mxu0 %v869_v0 }
  0x60   :  { %660 = vmatpush3.msra.mxu0 %v291_v39 }
  0x61   :  { %661 = vmatprep.subr.mxu0 %v869_v0 }
  0x62   :  { %662 = vmatpush3.msra.mxu0 %v290_v40 }
  0x63   :  { %663 = vmatprep.subr.mxu0 %v869_v0 }
  0x64   :  { %664 = vmatpush3.msra.mxu0 %v289_v41 }
  0x65   :  { %665 = vmatprep.subr.mxu0 %v869_v0 }
  0x66   :  { %666 = vmatpush3.msra.mxu0 %v288_v42 }
  0x67   :  { %667 = vmatprep.subr.mxu0 %v869_v0 }
  0x68   :  { %668 = vmatpush3.msra.mxu0 %v287_v43 }
  0x69   :  { %669 = vmatprep.subr.mxu0 %v869_v0 }
  0x6a   :  { %670 = vmatpush3.msra.mxu0 %v286_v44 }
  0x6b   :  { %671 = vmatprep.subr.mxu0 %v869_v0 }
  0x6c   :  { %672 = vmatpush3.msra.mxu0 %v285_v45 }
  0x6d   :  { %673 = vmatprep.subr.mxu0 %v869_v0 }
  0x6e   :  { %674 = vmatpush3.msra.mxu0 %v284_v46 }
  0x6f   :  { %675 = vmatprep.subr.mxu0 %v869_v0 }
  0x70   :  { %676 = vmatpush3.msra.mxu0 %v283_v52 }
  0x71   :  { %677 = vmatprep.subr.mxu0 %v869_v0 }
  0x72   :  { %678 = vmatpush3.msra.mxu0 %v282_v53 }
  0x73   :  { %679 = vmatprep.subr.mxu0 %v869_v0 }
  0x74   :  { %680 = vmatpush3.msra.mxu0 %v281_v54 }
 0x114   :  { %v181_v48 = vpop.f32.mrf.mxu0 }
 0x115   :  { %v182_v49 = vadd.f32 %v506_v47, %v181_v48 }
 0x116   :  { %v613_v50 = vpop.f32.mrf.mxu0 }
 0x117   :  { %v185_v51 = vmax.f32 %v182_v49, 0.0 }
 0x119   :  { %647 = vmatmul.mubr.f32.vlgmr.msra.gmra.mxu1 %v185_v51 }
 0x11a   :  { %716 = vmatprep.mubr.msk.f32.mxu1 %vm870_vm0, %v869_v0  ;;  %685 = vmatpush3.msra.mxu1 %v390_v55 }
 0x11b   :  { %686 = vmatprep.subr.mxu1 %v869_v0 }
 0x11c   :  { %687 = vmatpush3.msra.mxu1 %v389_v56 }
 0x11d   :  { %688 = vmatprep.subr.mxu1 %v869_v0 }
 0x11e   :  { %689 = vmatpush3.msra.mxu1 %v388_v57 }
 0x11f   :  { %690 = vmatprep.subr.mxu1 %v869_v0 }
 0x120   :  { %691 = vmatpush3.msra.mxu1 %v387_v58 }
 0x121   :  { %692 = vmatprep.subr.mxu1 %v869_v0 }
 0x122   :  { %693 = vmatpush3.msra.mxu1 %v386_v59 }
 0x123   :  { %694 = vmatprep.subr.mxu1 %v869_v0 }
 0x124   :  { %695 = vmatpush3.msra.mxu1 %v385_v60 }
 0x125   :  { %696 = vmatprep.subr.mxu1 %v869_v0 }
 0x126   :  { %697 = vmatpush3.msra.mxu1 %v384_v61 }
 0x127   :  { %698 = vmatprep.subr.mxu1 %v869_v0 }
 0x128   :  { %699 = vmatpush3.msra.mxu1 %v383_v62 }
 0x129   :  { %700 = vmatprep.subr.mxu1 %v869_v0 }
 0x12a   :  { %701 = vmatpush3.msra.mxu1 %v382_v63 }
 0x12b   :  { %702 = vmatprep.subr.mxu1 %v869_v0 }
 0x12c   :  { %703 = vmatpush3.msra.mxu1 %v381_v1 }
 0x12d   :  { %704 = vmatprep.subr.mxu1 %v869_v0 }
 0x12e   :  { %705 = vmatpush3.msra.mxu1 %v380_v2 }
 0x12f   :  { %706 = vmatprep.subr.mxu1 %v869_v0 }
 0x130   :  { %707 = vmatpush3.msra.mxu1 %v379_v3 }
 0x131   :  { %708 = vmatprep.subr.mxu1 %v869_v0 }
 0x132   :  { %709 = vmatpush3.msra.mxu1 %v378_v4 }
 0x133   :  { %710 = vmatprep.subr.mxu1 %v869_v0 }
 0x134   :  { %711 = vmatpush3.msra.mxu1 %v377_v10 }
 0x135   :  { %712 = vmatprep.subr.mxu1 %v869_v0 }
 0x136   :  { %713 = vmatpush3.msra.mxu1 %v376_v11 }
 0x137   :  { %714 = vmatprep.subr.mxu1 %v869_v0 }
 0x138   :  { %715 = vmatpush3.msra.mxu1 %v375_v12 }
 0x1d9   :  { %v275_v6 = vpop.f32.mrf.mxu1 }
 0x1da   :  { %v276_v7 = vadd.f32 %v507_v5, %v275_v6 }
 0x1db   :  { %v648_v8 = vpop.f32.mrf.mxu1 }
 0x1dc   :  { %v279_v9 = vmax.f32 %v276_v7, 0.0 }
 0x1de   :  { %280 = vst [vmem:[#allocation10] sm:$0xff] %v279_v9  ;;  %682 = vmatmul.mubr.f32.vlgmr.msra.gmra.mxu0 %v279_v9 }
 0x29e   :  { %v370_v14 = vpop.f32.mrf.mxu0 }
 0x29f   :  { %v371_v15 = vadd.f32 %v508_v13, %v370_v14 }
 0x2a0   :  { %v683_v16 = vpop.f32.mrf.mxu0 }
 0x2a1   :  { %v374_v17 = vmax.f32 %v371_v15, 0.0 }
 0x2a3   :  { %717 = vmatmul.mubr.f32.vlgmr.msra.gmra.mxu1 %v374_v17 }
 0x2a4   :  { %824 = shalt.err (!%p821_p10)
}
 0x2a5   :  { %484 = dma.vmem_to_hbm [thread:$0]  %s482_s17, 128, %s1054_s9, [#allocation4]   ;;  %v509_v0 = vld [vmem:[%s1053_s8] ss:$0 sm:$0xff] }
 0x2a6   :  { %s872_s22 = smov [#allocation11]  }
 0x2a7   :  { %s491_s23 = sshll.u32 %s872_s22, 4  ;;  %s492_s23 = int_to_ptr.vmem [resolvable:$true] %s491_s23 }
 0x2a8   :  { %s833_s24 = scalar_lea.vmem %s492_s23, 128  ;;  %p838_p12 = scmp.lt.s32.totalorder %s492_s23, %s492_s23 }
 0x2a9   :  { %p834_p11 = scmp.ne.s32.totalorder %s492_s23, %s833_s24  ;;  %p839_p13 = scmp.lt.s32.totalorder %s833_s24, %s833_s24 }
 0x2ab   :  { %p840_p0 = por %p839_p13, %p838_p12 }
 0x2ad   :  { %p841_p1 = pnand %p840_p0, %p834_p11 }
 0x363   :  { %v464_v18 = vpop.f32.mrf.mxu1 }
 0x364   :  { %v465_v19 = vadd.f32 %v509_v0, %v464_v18 }
 0x365   :  { %v718_v20 = vpop.f32.mrf.mxu1 }
 0x366   :  { %v510_v21 = vmul.f32 -1.442695, %v465_v19 }
 0x368   :  { %729 = vpow2.f32 %v510_v21 }
 0x375   :  { %v730_v22 = vpop.eup %729 }
 0x376   :  { %v471_v23 = vadd.f32 1.0, %v730_v22 }
 0x378   :  { %731 = vrcp.f32 %v471_v23 }
 0x385   :  { %v732_v24 = vpop.eup %731 }
 0x386   :  { %474 = vst [vmem:[#allocation11] sm:$0xff] %v732_v24 }
 0x387   :  { %844 = shalt.err (!%p841_p1)
}
 0x388   :  { %494 = dma.vmem_to_hbm [thread:$0]  %s492_s23, 128, %s1055_s10, [#allocation12]  }
 0x389   :  { %859 = dma.done.wait [#allocation4], 128  }
 0x38a   :  { %860 = vsyncadd [#allocation4], 4294967168 }
 0x38b   :  { %861 = dma.done.wait [#allocation12], 128  }
 0x38c   :  { %862 = vsyncadd [#allocation12], 4294967168 }
 0x38d   :  { %501 = vsyncpa [#allocation3], 1 }
 0x38e   :  { %502 = vsyncpa [#allocation6], 1 }
 0x38f   :  { %503 = vsyncpa [#allocation9], 1 }
 0x390   :  { %504 = vsyncpa [#allocation4], 1 }
 0x391   :  { %505 = vsyncpa [#allocation12], 1 }

</bundles_post_ra>
